<compile_context>
chip_gen: v7x
topology: tpu7x:2x2x1
jax: 0.10.0
libtpu: 0.0.40
codegen_flags: <defaults>
</compile_context>

<pallas_src>
import functools

import jax
import jax.numpy as jnp
from jax.experimental import pallas as pl
from jax.experimental.pallas import tpu as pltpu


# ----------------------------------------------------------------------------
# Kernels.  One grid step == one (batch, seq-tile); batch dim is squeezed.
# Blocks seen by the kernels:  q (H,1,D), k (H,TS,D), out (H,TS).
# ----------------------------------------------------------------------------

def _dot_kernel(q_ref, k_ref, o_ref, *, scale):
    q = q_ref[...] * scale                                   # fold 1/sqrt(D)
    o_ref[...] = jnp.sum(q * k_ref[...], axis=-1).astype(o_ref.dtype)


def _bilinear_kernel(q_ref, k_ref, wh_ref, o_ref, *, scale):
    # scores[h,s] = sum_d K[h,s,d] * q_eff[h,d],
    # q_eff[h,d]  = sum_e (Q[h,0,e]*scale) * W_h[h,d,e]   (tiny, VPU+XLU)
    q = q_ref[...] * scale                                   # (H, 1, E)
    q_eff = jnp.sum(q * wh_ref[...], axis=-1)                # (H, D)
    o_ref[...] = jnp.sum(q_eff[:, None, :] * k_ref[...],
                         axis=-1).astype(o_ref.dtype)


def _concat_kernel(pq_ref, k_ref, wck_ref, wo_ref, o_ref):
    # pq = Q @ W_c[:, :D, :] + bias  (hoisted out of the kernel: M=1 matvec)
    proj_k = jnp.einsum('hsd,hde->hse', k_ref[...], wck_ref[...],
                        preferred_element_type=jnp.float32)  # MXU
    hidden = jax.nn.relu(proj_k + pq_ref[...])               # (H, TS, D)
    # N=1 output matvec on the VPU/XLU (overlaps with the MXU projection).
    o_ref[...] = jnp.sum(hidden * wo_ref[...][:, None, :],
                         axis=-1).astype(o_ref.dtype)


def _hadamard_kernel(wq_ref, k_ref, b_ref, wo_ref, o_ref):
    # Wq[h,d,e] = Q[h,0,d] * W_h[h,d,e] (folded outside); proj = K @ Wq.
    proj = jnp.einsum('hsd,hde->hse', k_ref[...], wq_ref[...],
                      preferred_element_type=jnp.float32)    # MXU
    hidden = jax.nn.relu(proj + b_ref[...])                  # (H, TS, D)
    o_ref[...] = jnp.sum(hidden * wo_ref[...][:, None, :],
                         axis=-1).astype(o_ref.dtype)


# ----------------------------------------------------------------------------
# Wrapper
# ----------------------------------------------------------------------------

def _pick_seq_tile(S, H, D, itemsize, budget_bytes=24 * 1024 * 1024):
    """Largest 128-multiple seq tile that divides S and fits the VMEM budget."""
    for ts in (1024, 512, 256, 128):
        if S % ts == 0:
            k_bytes = 2 * H * ts * D * itemsize      # double-buffered K tile
            tmp_bytes = 3 * H * ts * D * 4           # f32 intermediates
            out_bytes = 2 * H * ts * 4               # double-buffered output
            if k_bytes + tmp_bytes + out_bytes <= budget_bytes:
                return ts
    return S  # full-extent block (always a valid BlockSpec)


def attn_scores(Q, K, params, score_fn_type="dot"):
    """Q: [B,H,1,D], K: [B,H,S,D] -> scores [B,H,S]."""
    B, H, S, D = K.shape
    assert Q.shape == (B, H, 1, D)
    scale = 1.0 / (D ** 0.5)
    out_dtype = Q.dtype

    TS = _pick_seq_tile(S, H, D, K.dtype.itemsize)
    grid = (B, S // TS)

    # Per-(batch, seq-tile) blocks; batch squeezed, heads/head-dim full.
    q_spec = pl.BlockSpec((None, H, 1, D), lambda b, s: (b, 0, 0, 0))
    k_spec = pl.BlockSpec((None, H, TS, D), lambda b, s: (b, 0, s, 0))
    o_spec = pl.BlockSpec((None, H, TS), lambda b, s: (b, 0, s))
    out_shape = jax.ShapeDtypeStruct((B, H, S), out_dtype)

    def full_spec(arr):
        nd = arr.ndim
        return pl.BlockSpec(arr.shape, lambda b, s, _nd=nd: (0,) * _nd)

    cparams = pltpu.CompilerParams(
        dimension_semantics=("parallel", "parallel"),
        vmem_limit_bytes=48 * 1024 * 1024,
    )

    if score_fn_type == "dot":
        return pl.pallas_call(
            functools.partial(_dot_kernel, scale=scale),
            out_shape=out_shape, grid=grid,
            in_specs=[q_spec, k_spec], out_specs=o_spec,
            compiler_params=cparams,
        )(Q, K)

    if score_fn_type == "bilinear":
        W_h = params["W_h"]
        return pl.pallas_call(
            functools.partial(_bilinear_kernel, scale=scale),
            out_shape=out_shape, grid=grid,
            in_specs=[q_spec, k_spec, full_spec(W_h)], out_specs=o_spec,
            compiler_params=cparams,
        )(Q, K, W_h)

    if score_fn_type == "concat":
        W_c = params["W_c"]                        # (H, 2D, D)
        W_c_k = W_c[:, D:, :]                      # K-side weight into kernel
        W_o = params["W_o"][..., 0]                # (H, D)
        # Hoist the M=1 query projection (+bias): tiny, MXU-hostile in-kernel.
        proj_q = jnp.einsum('bhqd,hde->bhqe', Q, W_c[:, :D, :],
                            precision=jax.lax.Precision.HIGHEST) + params["bias"]
        pq_spec = pl.BlockSpec((None, H, 1, D), lambda b, s: (b, 0, 0, 0))
        return pl.pallas_call(
            _concat_kernel,
            out_shape=out_shape, grid=grid,
            in_specs=[pq_spec, k_spec, full_spec(W_c_k), full_spec(W_o)],
            out_specs=o_spec,
            compiler_params=cparams,
        )(proj_q, K, W_c_k, W_o)

    if score_fn_type == "hadamard":
        W_h = params["W_h"]
        bias = params["bias"]
        W_o = params["W_o"][..., 0]
        # Fold Q into the per-head weight: Wq[b,h,d,e] = Q[b,h,0,d]*W_h[h,d,e].
        Wq = Q[:, :, 0, :, None] * W_h[None]       # (B, H, D, D): tiny
        wq_spec = pl.BlockSpec((None, H, D, D), lambda b, s: (b, 0, 0, 0))
        return pl.pallas_call(
            _hadamard_kernel,
            out_shape=out_shape, grid=grid,
            in_specs=[wq_spec, k_spec, full_spec(bias), full_spec(W_o)],
            out_specs=o_spec,
            compiler_params=cparams,
        )(Wq, K, bias, W_o)

    raise ValueError("fn_type must be dot, bilinear, concat or hadamard")
    # TODO(synk): for small D (<128) a block-diagonal H*D lane-packing of K
    # would further improve MXU/vld utilisation; omitted to keep layouts simple.


# ----------------------------------------------------------------------------
# Pure-JAX reference (mirrors the PyTorch module exactly)
# ----------------------------------------------------------------------------

def ref_scores(Q, K, params, score_fn_type):
    D = K.shape[-1]
    hi = jax.lax.Precision.HIGHEST
    Q_e = jnp.broadcast_to(Q, K.shape)
    if score_fn_type == "dot":
        return jnp.sum(Q_e * K, axis=-1) / (D ** 0.5)
    if score_fn_type == "bilinear":
        K_proj = jnp.einsum('bhkd,hde->bhke', K, params["W_h"], precision=hi)
        return jnp.sum(Q_e * K_proj, axis=-1) / (D ** 0.5)
    if score_fn_type == "concat":
        QK_cat = jnp.concatenate([Q_e, K], axis=-1)
        proj = jnp.einsum('bhke,hed->bhkd', QK_cat, params["W_c"], precision=hi)
        hidden = jax.nn.relu(proj + params["bias"])
        return jnp.einsum('bhkd,hde->bhk', hidden, params["W_o"], precision=hi)
    if score_fn_type == "hadamard":
        had = Q_e * K
        proj = jnp.einsum('bhkd,hde->bhke', had, params["W_h"], precision=hi)
        hidden = jax.nn.relu(proj + params["bias"])
        return jnp.einsum('bhkd,hde->bhk', hidden, params["W_o"], precision=hi)
    raise ValueError(score_fn_type)


# ----------------------------------------------------------------------------
# Main
# ----------------------------------------------------------------------------

if __name__ == "__main__":
    B, n_heads, head_dim, S = 2, 4, 32, 8

    key = jax.random.PRNGKey(0)
    kq, kk, kwh, kwc, kwo, kb = jax.random.split(key, 6)

    Q = jax.random.normal(kq, (B, n_heads, 1, head_dim), dtype=jnp.float32)
    K = jax.random.normal(kk, (B, n_heads, S, head_dim), dtype=jnp.float32)

    std = 1.0 / head_dim ** 0.5
    params = {
        "W_h": std * jax.random.normal(kwh, (n_heads, head_dim, head_dim), jnp.float32),
        "W_c": std * jax.random.normal(kwc, (n_heads, 2 * head_dim, head_dim), jnp.float32),
        "W_o": std * jax.random.normal(kwo, (n_heads, head_dim, 1), jnp.float32),
        "bias": 0.1 * jax.random.normal(kb, (n_heads, 1, head_dim), jnp.float32),
    }

    for fn_type in ("dot", "bilinear", "concat", "hadamard"):
        out = jax.block_until_ready(attn_scores(Q, K, params, fn_type))
        ref = ref_scores(Q, K, params, fn_type)
        assert out.shape == (B, n_heads, S), (fn_type, out.shape)
        assert out.dtype == Q.dtype, (fn_type, out.dtype)
        assert jnp.allclose(out, ref, atol=1e-4, rtol=1e-4), fn_type

    print("KERNEL_OK")
</pallas_src>

<mosaic_0001>
module attributes {stable_mosaic.version = 11 : i64} {
  func.func @_dot_kernel(%arg0: i32, %arg1: i32, %arg2: memref<1x4x1x32xf32, #tpu.memory_space<vmem>>, %arg3: memref<1x4x8x32xf32, #tpu.memory_space<vmem>>, %arg4: memref<1x4x8xf32, #tpu.memory_space<vmem>>) attributes {dimension_semantics = [#tpu.dimension_semantics<parallel>, #tpu.dimension_semantics<parallel>], iteration_bounds = array<i64: 2, 1>, scalar_prefetch = 0 : i64, scratch_operands = 0 : i64, tpu.core_type = #tpu.core_type<tc>, window_params = [{transform_indices = @transform_0, window_bounds = array<i64: 1, 4, 1, 32>}, {transform_indices = @transform_1, window_bounds = array<i64: 1, 4, 8, 32>}, {transform_indices = @transform_2, window_bounds = array<i64: 1, 4, 8>}]} {
    %c0 = arith.constant 0 : index
    %c0_0 = arith.constant 0 : index
    %c0_1 = arith.constant 0 : index
    %c0_2 = arith.constant 0 : index
    %0 = vector.load %arg2[%c0, %c0_0, %c0_1, %c0_2] : memref<1x4x1x32xf32, #tpu.memory_space<vmem>>, vector<1x4x1x32xf32>
    %1 = vector.shape_cast %0 : vector<1x4x1x32xf32> to vector<4x1x32xf32>
    %cst = arith.constant 0.176776692 : f32
    %2 = vector.broadcast %cst : f32 to vector<4x1x32xf32>
    %3 = arith.mulf %1, %2 : vector<4x1x32xf32>
    %c0_3 = arith.constant 0 : index
    %c0_4 = arith.constant 0 : index
    %c0_5 = arith.constant 0 : index
    %c0_6 = arith.constant 0 : index
    %4 = vector.load %arg3[%c0_3, %c0_4, %c0_5, %c0_6] : memref<1x4x8x32xf32, #tpu.memory_space<vmem>>, vector<1x4x8x32xf32>
    %5 = vector.shape_cast %4 : vector<1x4x8x32xf32> to vector<4x8x32xf32>
    %6 = vector.broadcast %3 : vector<4x1x32xf32> to vector<4x8x32xf32>
    %7 = arith.mulf %6, %5 : vector<4x8x32xf32>
    %cst_7 = arith.constant dense<0.000000e+00> : vector<4x8xf32>
    %8 = vector.multi_reduction <add>, %7, %cst_7 [2] : vector<4x8x32xf32> to vector<4x8xf32>
    %c0_8 = arith.constant 0 : index
    %c0_9 = arith.constant 0 : index
    %c0_10 = arith.constant 0 : index
    %9 = vector.load %arg4[%c0_8, %c0_9, %c0_10] : memref<1x4x8xf32, #tpu.memory_space<vmem>>, vector<1x4x8xf32>
    %10 = vector.shape_cast %9 : vector<1x4x8xf32> to vector<4x8xf32>
    %11 = vector.shape_cast %8 : vector<4x8xf32> to vector<1x4x8xf32>
    tpu.vector_store %arg4[%c0_8, %c0_9, %c0_10], %11 {strides = array<i32>} : memref<1x4x8xf32, #tpu.memory_space<vmem>>, vector<1x4x8xf32>,
    return
  }
  func.func @transform_0(%arg0: i32, %arg1: i32) -> (i32, i32, i32, i32) {
    %c0_i32 = arith.constant 0 : i32
    %c0_i32_0 = arith.constant 0 : i32
    %c0_i32_1 = arith.constant 0 : i32
    %c0_i32_2 = arith.constant 0 : i32
    return %arg0, %c0_i32, %c0_i32_0, %c0_i32_1 : i32, i32, i32, i32
  }
  func.func @transform_1(%arg0: i32, %arg1: i32) -> (i32, i32, i32, i32) {
    %c0_i32 = arith.constant 0 : i32
    %c0_i32_0 = arith.constant 0 : i32
    %c0_i32_1 = arith.constant 0 : i32
    return %arg0, %c0_i32, %arg1, %c0_i32_0 : i32, i32, i32, i32
  }
  func.func @transform_2(%arg0: i32, %arg1: i32) -> (i32, i32, i32) {
    %c0_i32 = arith.constant 0 : i32
    %c0_i32_0 = arith.constant 0 : i32
    return %arg0, %c0_i32, %arg1 : i32, i32, i32
  }
}

</mosaic_0001>

<bundles_post_ra>
// kernel: tpu_custom_call.1
= control target key start
LH: loop header
LB: loop body
LE: loop exit
PB: predicated region body
PF: predicated region fallthrough
CT: control target
= control target key end

     0   :  { %7 = vsyncpa [#allocation3], 0  ;;  %s910_s0 = inlined_call_operand.hbm [shape: f32[2,4,1,32], index: 0, kind: input, shape index: {}]   ;;  %s911_s1 = inlined_call_operand.hbm [shape: f32[2,4,8,32], index: 1, kind: input, shape index: {}]   ;;  %s912_s2 = inlined_call_operand.hbm [shape: f32[2,4,8], index: 2, kind: output, shape index: {}]  }
   0x1   :  { %9 = vsyncpa [#allocation3 + $0x1], 0 }
   0x2   :  { %10 = vsyncpa [#allocation6], 0 }
   0x3   :  { %12 = vsyncpa [#allocation6 + $0x1], 0 }
   0x4   :  { %13 = vsyncpa [#allocation4], 0 }
   0x5   :  { %15 = vsyncpa [#allocation4 + $0x1], 0  ;;  %s683_s9 = smov 0   ;;  %s685_s10 = smov 0  }
   0x6   :  { %s687_s11 = smov 0   ;;  %s689_s12 = smov 0  }
   0x7   :  { %s691_s13 = smov 0   ;;  %s693_s14 = smov 0  }
   0x8 LB: > { %s422_s15 = sadd.s32 4294967295, %s659_s14   ;;  %s423_s16 = sadd.s32 4294967294, %s659_s14   ;;  %s659_s14 = sphi %s693_s14, %s21_s14   ;;  %s655_s13 = sphi %s691_s13, %s930_s13   ;;  %s651_s12 = sphi %s689_s12, %s929_s12   ;;  %s647_s11 = sphi %s687_s11, %s928_s11   ;;  %s643_s10 = sphi %s685_s10, %s927_s10   ;;  %s639_s9 = sphi %s683_s9, %s926_s9  }
   0x9   : > { %s33_s17 = sadd.s32 1, %s655_s13  ;;  %s40_s18 = sadd.s32 1, %s647_s11 }
   0xa   : > { %p35_p0 = scmp.ge.s32.totalorder %s33_s17, 2  ;;  %p47_p1 = scmp.ne.s32.totalorder %s647_s11, %s643_s10 }
   0xb   : > { %p48_p2 = scmp.eq.s32.totalorder %s659_s14, 0  ;;  %p53_p3 = scmp.ne.s32.totalorder %s643_s10, %s639_s9 }
   0xc   : > { %s932_s17 = smov (%p35_p0, %s33_s17), 0  ;;  %p54_p5 = scmp.eq.s32.totalorder %s422_s15, 0 }
   0xd   : > { %p724_p4 = por %p48_p2, %p47_p1  ;;  %s37_s20 = ssub.s32 %s655_s13, %s932_s17 }
   0xe   : > { %p107_p6 = scmp.eq.s32.totalorder %s422_s15, 1  ;;  %p38_p7 = scmp.eq.s32.totalorder %s37_s20, 0 }
   0xf   : > { %p730_p8 = por %p54_p5, %p53_p3  ;;  %p113_p10 = scmp.eq.s32.totalorder %s423_s16, 1 }
  0x10   : > { %p734_p9 = por %p107_p6, %p47_p1  ;;  %p459_p13 = scmp.lt.s32.totalorder %s659_s14, 2 }
  0x11   : > { %s916_s21 = scalar_select %p730_p8, 1, 0 }
  0x12   : > { %s917_s22 = scalar_select %p734_p9, 1, 0 }
  0x13   : > { %s739_s23 = scalar_select %p38_p7, %s647_s11, %s40_s18  }
  0x14   : > { %p741_p11 = por %p113_p10, %p53_p3  ;;  %s748_s25 = sand.u32 1, %s647_s11  }
  0x15   : > { %s426_s26 = sshll.u32 %s748_s25, 2  ;;  %s440_s27 = sshll.u32 %s655_s13, 6 }
  0x16   : > { %s918_s24 = scalar_select %p741_p11, 1, 0 }
  0x17   : > { %s755_s30 = scalar_lea.hbm %s910_s0, %s440_s27  ;;  %s137_s3 = scalar_lea.vmem [#allocation2], %s426_s26 }
  0x18   : > { %s144_s4 = sshll.u32 %s137_s3, 4  ;;  %p761_p0 = pnand %p459_p13, %p724_p4  ;;  %s757_s4 = int_to_ptr.vmem [resolvable:$true] %s144_s4 }
  0x19   : > { %s134_s6 = scalar_lea.sflag [#allocation3], %s748_s25  ;;  %s513_s7 = scalar_lea.hbm %s755_s30, 64 }
  0x1a   : > { %p514_p2 = scmp.ne.s32.totalorder %s755_s30, %s513_s7  ;;  %p515_p3 = pneg %p761_p0 }
  0x1b   : > { %s518_s16 = scalar_lea.hbm %s910_s0, 128  ;;  %p519_p4 = scmp.lt.u32.totalorder %s755_s30, %s910_s0 }
  0x1c   : > { %p516_p5 = pnand %p515_p3, %p514_p2  ;;  %p520_p7 = scmp.lt.u32.totalorder %s518_s16, %s513_s7 }
  0x1d   : > { %p522_p13 = scmp.lt.u32.totalorder %s513_s7, %s755_s30 }
  0x1e   : > { %p517_p6 = pneg %p516_p5  ;;  %p521_p10 = por %p520_p7, %p519_p4 }
  0x20   : > { %p523_p12 = por %p522_p13, %p521_p10 }
  0x22   : > { %p524_p1 = pnand %p523_p12, %p517_p6 }
  0x24   : > { %527 = shalt.err (!%p524_p1)
}
  0x25   : > { %s528_s20 = scalar_lea.vmem %s757_s4, 64  ;;  %s661_s26 = smov [#allocation2]  }
  0x26   : > { %p529_p2 = scmp.ne.s32.totalorder %s757_s4, %s528_s20  ;;  %s533_s27 = sshll.u32 %s661_s26, 4  ;;  %s534_s27 = int_to_ptr.vmem [resolvable:$false] %s533_s27 }
  0x27   : > { %s535_s28 = scalar_lea.vmem %s534_s27, 128  ;;  %p536_p9 = scmp.lt.s32.totalorder %s757_s4, %s534_s27 }
  0x28   : > { %p531_p5 = pnand %p529_p2, %p515_p3  ;;  %p537_p4 = scmp.lt.s32.totalorder %s535_s28, %s528_s20 }
  0x2a   : > { %p532_p11 = pneg %p531_p5  ;;  %p538_p7 = por %p537_p4, %p536_p9 }
  0x2c   : > { %p539_p10 = pnand %p538_p7, %p532_p11 }
  0x2e   : > { %542 = shalt.err (!%p539_p10)
}
  0x2f   : > { %s662_s29 = smov 16   ;;  %s663_s3 = smov 1  }
  0x30   : > { %451 = dma.hbm_to_vmem [thread:$0]  (!%p761_p0), %s755_s30, 64, %s757_s4, %s134_s6, %s662_s29, %s662_s29, %s663_s3  }
  0x31   : > { %p174_p12 = scmp.lt.s32.totalorder %s659_s14, 3  ;;  %s429_s7 = sshll.u32 %s748_s25, 5 }
  0x32   : > { %s441_s8 = sshll.u32 %s655_s13, 9  ;;  %p920_p9 = scmp.ge.s32.totalorder %s659_s14, 1 }
  0x33   : > { %s806_s19 = scalar_lea.hbm %s911_s1, %s441_s8  ;;  %s158_s20 = scalar_lea.vmem [#allocation5], %s429_s7 }
  0x34   : > { %p799_p11 = pnand %p920_p9, %p174_p12  ;;  %s166_s26 = sshll.u32 %s158_s20, 4  ;;  %s808_s26 = int_to_ptr.vmem [resolvable:$true] %s166_s26 }
  0x35   : > { %s155_s30 = scalar_lea.sflag [#allocation6], %s748_s25  ;;  %s543_s4 = scalar_lea.hbm %s806_s19, 512 }
  0x36   : > { %p544_p1 = scmp.ne.s32.totalorder %s806_s19, %s543_s4  ;;  %s548_s28 = scalar_lea.hbm %s911_s1, 1024 }
  0x37   : > { %p549_p2 = scmp.lt.u32.totalorder %s806_s19, %s911_s1  ;;  %p550_p5 = scmp.lt.u32.totalorder %s548_s28, %s543_s4 }
  0x38   : > { %p546_p6 = pnand %p544_p1, %p515_p3  ;;  %p552_p7 = scmp.lt.u32.totalorder %s543_s4, %s806_s19 }
  0x39   : > { %p551_p4 = por %p550_p5, %p549_p2 }
  0x3a   : > { %p547_p13 = pneg %p546_p6 }
  0x3b   : > { %p553_p10 = por %p552_p7, %p551_p4 }
  0x3d   : > { %p554_p12 = pnand %p553_p10, %p547_p13 }
  0x3f   : > { %557 = shalt.err (!%p554_p12)
}
  0x40   : > { %s558_s7 = scalar_lea.vmem %s808_s26, 512  ;;  %s664_s8 = smov [#allocation5]  }
  0x41   : > { %p559_p9 = scmp.ne.s32.totalorder %s808_s26, %s558_s7  ;;  %s563_s16 = sshll.u32 %s664_s8, 4  ;;  %s564_s16 = int_to_ptr.vmem [resolvable:$false] %s563_s16 }
  0x42   : > { %s565_s18 = scalar_lea.vmem %s564_s16, 1024  ;;  %p566_p8 = scmp.lt.s32.totalorder %s808_s26, %s564_s16 }
  0x43   : > { %p561_p1 = pnand %p559_p9, %p515_p3  ;;  %p567_p2 = scmp.lt.s32.totalorder %s565_s18, %s558_s7 }
  0x45   : > { %p562_p6 = pneg %p561_p1  ;;  %p568_p5 = por %p567_p2, %p566_p8 }
  0x47   : > { %p569_p4 = pnand %p568_p5, %p562_p6 }
  0x49   : > { %572 = shalt.err (!%p569_p4)
}
  0x4a   : > { %s665_s20 = smov 128   ;;  %s666_s4 = smov 8  }
  0x4b   : > { %454 = dma.hbm_to_vmem [thread:$0]  (!%p761_p0), %s806_s19, 512, %s808_s26, %s155_s30, %s665_s20, %s665_s20, %s666_s4  }
  0x4c   : > { %178 = sbr.rel (%p799_p11) target bundleno = 263 (0x107), region = 28  ;;  %s839_s6 = sand.u32 (!%p799_p11), 1, %s643_s10  }
  0x4d   : > { %s433_s27 = sshll.u32 (!%p799_p11), %s839_s6, 2  ;;  %s181_s28 = scalar_lea.sflag (!%p799_p11), [#allocation3], %s839_s6 }
  0x4e   : > { %s184_s29 = scalar_lea.vmem (!%p799_p11), [#allocation2], %s433_s27  ;;  %p922_p8 = scmp.ne.s32.totalorder (!%p799_p11), %s916_s21, 0 }
  0x53   : > { %626 = dma.done.wait (%p922_p8), %s181_s28, 64  }
  0x54   : > { %628 = vsyncadd (%p922_p8), %s181_s28, 4294967232  ;;  %s434_s25 = sshll.u32 %s839_s6, 5  ;;  %s190_s5 = scalar_lea.sflag [#allocation6], %s839_s6 }
  0x55   : > { %s193_s15 = scalar_lea.vmem [#allocation5], %s434_s25 }
  0x56   : > { %630 = dma.done.wait (%p922_p8), %s190_s5, 512  }
  0x57   : > { %632 = vsyncadd (%p922_p8), %s190_s5, 4294966784  ;;  %v235_v0 = vlaneseq  ;;  %v219_v5 = vld [vmem:[%s184_s29] sm:$0x1]  ;;  %v221_v6 = vld [vmem:[%s184_s29 + $0x2] sm:$0x1]  ;;  %vm259_vm0 = vcmask 261120  }
  0x58   : > { %v223_v7 = vmul.f32 0.17677669, %v219_v5  ;;  %v227_v8 = vld [vmem:[%s193_s15] sm:$0xff]  ;;  %v225_v9 = vmul.f32 0.17677669, %v221_v6  ;;  %v229_v10 = vld [vmem:[%s193_s15 + $0x10] sm:$0xff] }
  0x59   : > { %v236_v1 = vshrl.u32 %v235_v0, 7  ;;  %v277_v2 = vand.u32 127, %v235_v0  ;;  %v220_v11 = vld [vmem:[%s184_s29 + $0x1] sm:$0x1]  ;;  %v222_v12 = vld [vmem:[%s184_s29 + $0x3] sm:$0x1] }
  0x5a   : > { %v224_v15 = vmul.f32 0.17677669, %v220_v11  ;;  %v226_v16 = vmul.f32 0.17677669, %v222_v12  ;;  %v228_v17 = vld [vmem:[%s193_s15 + $0x8] sm:$0xff]  ;;  %v230_v18 = vld [vmem:[%s193_s15 + $0x18] sm:$0xff] }
  0x5b   : > { %v280_v3 = vsub.s32 %v277_v2, %v236_v1  ;;  %v237_v4 = vsub.s32 0, %v236_v1  ;;  %vm294_vm1 = vcmask 1041409   ;;  %vm296_vm2 = vcmask 1042434   ;;  %s437_s21 = sshll.u32 %s651_s12, 6  ;;  %s218_s19 = scalar_lea.vmem [#allocation7], %s433_s27 }
  0x5c   : > { %s318_s26 = sshll.u32 %s218_s19, 4  ;;  %vm298_vm3 = vcmask 1043459   ;;  %vm301_vm4 = vcmask 60416   ;;  %s861_s7 = scalar_lea.hbm %s912_s2, %s437_s21  ;;  %s863_s26 = int_to_ptr.vmem [resolvable:$true] %s318_s26 }
  0x5d   : > { %v238_v13 = vrot.slane %v223_v7, %v237_v4  ;;  %v246_v14 = vrot.slane %v225_v9, %v237_v4  ;;  %v242_v21 = vrot.slane %v224_v15, %v237_v4  ;;  %v250_v22 = vrot.slane %v226_v16, %v237_v4  ;;  %s304_s12 = scalar_lea.sflag [#allocation4], %s839_s6  ;;  %s573_s8 = scalar_lea.vmem %s863_s26, 64 }
  0x5e   : > { %p574_p0 = scmp.ne.s32.totalorder %s863_s26, %s573_s8  ;;  %p923_p3 = scmp.ne.s32.totalorder %s917_s22, 0 }
  0x5f   : > { %v255_v19 = vmul.f32 %v238_v13, %v227_v8  ;;  %v257_v20 = vmul.f32 %v246_v14, %v229_v10  ;;  %v256_v25 = vmul.f32 %v242_v21, %v228_v17  ;;  %v258_v26 = vmul.f32 %v250_v22, %v230_v18  ;;  %s667_s16 = smov [#allocation7]  }
  0x60   : > { %p575_p11 = pnand %p574_p0, %p923_p3  ;;  %s577_s18 = sshll.u32 %s667_s16, 4  ;;  %s578_s18 = int_to_ptr.vmem [resolvable:$false] %s577_s18 }
  0x61   : > { %v260_v23 = vsel %vm259_vm0, %v255_v19, 0.0  ;;  %v266_v24 = vsel %vm259_vm0, %v257_v20, 0.0  ;;  %v263_v27 = vsel %vm259_vm0, %v256_v25, 0.0  ;;  %v269_v28 = vsel %vm259_vm0, %v258_v26, 0.0  ;;  %s579_s20 = scalar_lea.vmem %s578_s18, 128  ;;  %p580_p7 = scmp.lt.s32.totalorder %s863_s26, %s578_s18 }
  0x62   : > { %261 = vadd.xlane.f32.xlu0 %v260_v23  ;;  %267 = vadd.xlane.f32.xlu1 %v266_v24  ;;  %p576_p13 = pneg %p575_p11  ;;  %p581_p10 = scmp.lt.s32.totalorder %s579_s20, %s573_s8 }
  0x64   : > { %p582_p12 = por %p581_p10, %p580_p7 }
  0x66   : > { %264 = vadd.xlane.f32.xlu0 %v263_v27  ;;  %270 = vadd.xlane.f32.xlu1 %v269_v28  ;;  %p583_p9 = pnand %p582_p12, %p576_p13 }
  0xef   : > { %v262_v29 = vpop.xlane.xlu0 %261  ;;  %v268_v30 = vpop.xlane.xlu1 %267 }
  0xf0   : > { %v281_v33 = vrot.slane %v262_v29, %v280_v3  ;;  %v289_v36 = vrot.slane %v268_v30, %v280_v3 }
  0xf3   : > { %v265_v31 = vpop.xlane.xlu0 %264  ;;  %v271_v32 = vpop.xlane.xlu1 %270 }
  0xf4   : > { %v285_v34 = vrot.slane %v265_v31, %v280_v3  ;;  %v293_v35 = vrot.slane %v271_v32, %v280_v3 }
  0xf6   : > { %v295_v37 = vsel %vm294_vm1, %v285_v34, %v281_v33 }
  0xf7   : > { %v297_v38 = vsel %vm296_vm2, %v289_v36, %v295_v37 }
  0xf8   : > { %v299_v39 = vsel %vm298_vm3, %v293_v35, %v297_v38 }
  0xf9   : > { %302 = vst.msk [vmem:[%s218_s19] sm:$0xf] %vm301_vm4, %v299_v39 }
  0xfa   : > { %586 = shalt.err (!%p583_p9)
}
  0xfb   : > { %s587_s4 = scalar_lea.hbm %s861_s7, 64  ;;  %s591_s28 = scalar_lea.hbm %s912_s2, 128 }
  0xfc   : > { %p588_p1 = scmp.ne.s32.totalorder %s861_s7, %s587_s4  ;;  %p592_p5 = scmp.lt.u32.totalorder %s861_s7, %s912_s2 }
  0xfd   : > { %p593_p4 = scmp.lt.u32.totalorder %s591_s28, %s587_s4  ;;  %p595_p0 = scmp.lt.u32.totalorder %s587_s4, %s861_s7 }
  0xfe   : > { %p589_p6 = pnand %p588_p1, %p923_p3 }
  0xff   : > { %p594_p8 = por %p593_p4, %p592_p5 }
 0x100   : > { %p590_p2 = pneg %p589_p6 }
 0x101   : > { %p596_p11 = por %p595_p0, %p594_p8 }
 0x103   : > { %p597_p13 = pnand %p596_p11, %p590_p2 }
 0x105   : > { %600 = shalt.err (!%p597_p13)
}
 0x106   : > { %446 = dma.vmem_to_hbm [thread:$0]  (%p923_p3), %s863_s26, 64, %s861_s7, %s304_s12  }
 0x107 PF: > { %s330_s5 = sand.u32 1, %s639_s9   ;;  %p924_p7 = scmp.ne.s32.totalorder %s918_s24, 0 }
 0x108   : > { %p925_p10 = scmp.ge.s32.totalorder %s659_s14, 2  ;;  %s331_s15 = scalar_lea.sflag [#allocation4], %s330_s5 }
 0x10a   : > { %p456_p12 = pnand %p925_p10, %p924_p7 }
 0x10c   : > { %634 = dma.done.wait (!%p456_p12), %s331_s15, 64  }
 0x10d   : > { %636 = vsyncadd (!%p456_p12), %s331_s15, 4294967232  ;;  %s21_s14 = sadd.s32 1, %s659_s14   ;;  %s926_s9 = smov %s643_s10 }
 0x10e   : > { %p18_p9 = scmp.ge.s32.totalorder %s21_s14, 4   ;;  %s927_s10 = smov %s647_s11 }
 0x10f   : > { %s928_s11 = smov %s739_s23  ;;  %s929_s12 = smov %s655_s13 }
 0x110   : > { %s930_s13 = smov %s932_s17  ;;  %20 = sbr.rel (!%p18_p9) target bundleno = 8 (0x8), region = 86 }
 0x117   :  { %336 = vsyncpa [#allocation3], 1 }
 0x118   :  { %338 = vsyncpa [#allocation3 + $0x1], 1 }
 0x119   :  { %339 = vsyncpa [#allocation6], 1 }
 0x11a   :  { %341 = vsyncpa [#allocation6 + $0x1], 1 }
 0x11b   :  { %342 = vsyncpa [#allocation4], 1 }
 0x11c   :  { %344 = vsyncpa [#allocation4 + $0x1], 1 }

</bundles_post_ra>
